<compile_context>
chip_gen: v7x
topology: tpu7x:2x2x1
jax: 0.10.0
libtpu: 0.0.40
codegen_flags: <defaults>
</compile_context>

<pallas_src>
import functools
import math

import jax
import jax.numpy as jnp
from jax.experimental import pallas as pl
from jax.experimental.pallas import tpu as pltpu


def _round_up(x, m):
    return ((x + m - 1) // m) * m


def _detect_num_tensorcores():
    """Best-effort TensorCore-per-device count; falls back to 1 (always safe)."""
    candidates = []
    try:
        info = pltpu.get_tpu_info()
        for name in ("num_cores", "core_count", "num_tensorcores",
                     "tensorcores_per_chip", "cores_per_chip"):
            v = getattr(info, name, None)
            if v is not None:
                candidates.append(v)
    except Exception:
        pass
    try:
        v = getattr(jax.devices()[0], "num_cores", None)
        if v is not None:
            candidates.append(v)
    except Exception:
        pass
    for v in candidates:
        try:
            v = int(v)
        except Exception:
            continue
        if 1 <= v <= 8:
            return v
    return 1


def _quantile_loss_kernel(qw_ref, exp_ref, pred_ref, tgt_ref, out_ref, acc_ref,
                          *, valid_rows, inner_tiles):
    """Streaming pinball-loss partial sums.

    Grid is (num_partials, inner_tiles): the leading axis produces one partial
    sum per TensorCore (CORE_PARALLEL on multi-core chips); the trailing axis
    walks row tiles of the lane-dense (rows, W*Q) prediction view and is the
    reduction ("arbitrary") axis.
    """
    c = pl.program_id(0)          # partial-sum (core) index
    i = pl.program_id(1)          # row-tile index within this partial

    @pl.when(i == 0)
    def _():
        acc_ref[...] = jnp.zeros_like(acc_ref)

    tm, wq = pred_ref.shape
    g = c * inner_tiles + i       # logical global tile id
    row0 = g * tm

    # Skip redundant (fully out-of-range) trailing tiles of the last partial.
    @pl.when(row0 < valid_rows)
    def _():
        pred = pred_ref[...].astype(jnp.float32)          # (tm, W*Q)
        tgtc = tgt_ref[...].astype(jnp.float32)           # (tm, W) compact tgts
        # Expand each target across its Q prediction lanes on the (otherwise
        # idle) MXU:  exp_ref[a, p] = 1.0  iff  p // Q == a.
        tgt = jnp.dot(tgtc, exp_ref[...],
                      preferred_element_type=jnp.float32)  # (tm, W*Q)

        err = tgt - pred
        # pinball loss:  q*err if err >= 0 else (q-1)*err  ==  q*err - min(err, 0)
        losses = err * qw_ref[...] - jnp.minimum(err, 0.0)

        def accumulate(vals):
            # Sublane-group partial sums: plain vreg (VALU) adds on the
            # loop-carried path, no per-step cross-sublane XLU collapse.
            acc_ref[...] += vals.reshape(tm // 8, 8, wq).sum(axis=0)

        rem = valid_rows - row0

        @pl.when(rem >= tm)       # fast path: full tile, no masking work
        def _():
            accumulate(losses)

        @pl.when(rem < tm)        # tail tile: drop rows past the real extent
        def _():
            rid = jax.lax.broadcasted_iota(jnp.int32, (tm, wq), 0)
            accumulate(jnp.where(rid < rem, losses, 0.0))

    @pl.when(i == pl.num_programs(1) - 1)
    def _():
        out_ref[...] = acc_ref[...]


def quantile_loss(predictions, targets, quantiles, *, block_rows=None,
                  num_partials=None, block_bytes=2 * 1024 * 1024):
    """Pallas implementation of QuantileLoss.forward. Returns a scalar f32."""
    assert predictions.ndim == 3, \
        "Predictions must have shape [batch, time, num_quantiles]"
    B, T, Q = predictions.shape
    quantiles = jnp.asarray(quantiles, dtype=jnp.float32).reshape(-1)
    assert quantiles.shape[0] == Q, \
        "Number of quantiles in predictions must match quantiles provided"
    if targets.ndim == 3:
        assert targets.shape[2] == 1
        targets = targets[..., 0]
    assert targets.shape == (B, T), \
        "Batch and time dimensions must match between predictions and targets"

    # --- lane-dense views --------------------------------------------------
    # Row-major (B, T, Q) is viewed as (rows, W*Q) with W targets per row
    # (W*Q a multiple of 128); targets become the matching compact (rows, W).
    # Both are free reshapes of contiguous buffers.  The only wrapper copy is
    # a tiny ragged-tail zero-pad (< W rows, contributes exactly zero loss)
    # when B*T is not a multiple of W.
    N = B * T
    g = math.gcd(128, Q)
    W = max(8, 128 // g)
    WQ = W * Q

    rows = pl.cdiv(N, W)
    pad_n = rows * W - N
    pred_flat = predictions.reshape(-1)
    tgt_flat = targets.reshape(-1)
    if pad_n:
        pred_flat = jnp.pad(pred_flat, (0, pad_n * Q))
        tgt_flat = jnp.pad(tgt_flat, (0, pad_n))
    pred2 = pred_flat.reshape(rows, WQ)
    tgt2 = tgt_flat.reshape(rows, W)

    # Tiny constants: per-lane quantile weights and the 0/1 expansion matrix.
    qw = jnp.tile(quantiles, W).reshape(1, WQ)                          # (1, WQ)
    lane_tgt = (jnp.arange(WQ, dtype=jnp.int32) // Q)[None, :]
    exp_mat = (lane_tgt == jnp.arange(W, dtype=jnp.int32)[:, None]
               ).astype(jnp.float32)                                    # (W, WQ)

    # --- tiling --------------------------------------------------------------
    # Sublane multiple depends on dtype packing (f32 -> 8, bf16 -> 16, i8 -> 32).
    p_item = min(max(predictions.dtype.itemsize, 1), 4)
    t_item = min(max(targets.dtype.itemsize, 1), 4)
    row_mult = max(8 * (4 // p_item), 8 * (4 // t_item))

    if block_rows is None:
        block_rows = max(row_mult, block_bytes // (WQ * 4))
    cap = _round_up(rows, row_mult)
    tm = max(row_mult, min((block_rows // row_mult) * row_mult, cap))
    n_tiles = pl.cdiv(rows, tm)

    ncores = _detect_num_tensorcores()
    if num_partials is None:
        num_partials = ncores
    split = max(1, min(num_partials, n_tiles))
    inner = pl.cdiv(n_tiles, split)

    if split > 1 and split == ncores:
        sem0 = pltpu.CORE_PARALLEL      # one partial per TensorCore (v7x/megacore)
    elif split > 1:
        sem0 = pltpu.PARALLEL
    else:
        sem0 = pltpu.ARBITRARY

    def data_map(c, i):
        # Clamp so redundant trailing steps stay in bounds; they are skipped
        # inside the kernel (row0 >= valid_rows).
        return (jnp.minimum(c * inner + i, n_tiles - 1), 0)

    kernel = functools.partial(_quantile_loss_kernel,
                               valid_rows=rows, inner_tiles=inner)

    in_bytes = (pred2.size * pred2.dtype.itemsize
                + tgt2.size * tgt2.dtype.itemsize
                + qw.size * 4 + exp_mat.size * 4)
    cost = pl.CostEstimate(
        flops=2 * rows * W * WQ + 4 * rows * WQ,
        transcendentals=0,
        bytes_accessed=in_bytes + split * 8 * WQ * 4)

    partials = pl.pallas_call(
        kernel,
        out_shape=jax.ShapeDtypeStruct((split, 8, WQ), jnp.float32),
        grid_spec=pltpu.PrefetchScalarGridSpec(
            num_scalar_prefetch=0,
            grid=(split, inner),
            in_specs=[
                pl.BlockSpec((1, WQ), lambda c, i: (0, 0)),    # quantile weights
                pl.BlockSpec((W, WQ), lambda c, i: (0, 0)),    # target expansion
                pl.BlockSpec((tm, WQ), data_map),              # predictions
                pl.BlockSpec((tm, W), data_map),               # compact targets
            ],
            out_specs=pl.BlockSpec((None, 8, WQ), lambda c, i: (c, 0, 0)),
            scratch_shapes=[pltpu.VMEM((8, WQ), jnp.float32)],
        ),
        compiler_params=pltpu.CompilerParams(
            dimension_semantics=(sem0, pltpu.ARBITRARY),
            vmem_limit_bytes=32 * 1024 * 1024,
        ),
        cost_estimate=cost,
    )(qw, exp_mat, pred2, tgt2)

    # Tiny final reduction (split * 8 * W*Q values) + mean normalization.
    return jnp.sum(partials) / (B * T * Q)


def quantile_loss_ref(predictions, targets, quantiles):
    """Pure-JAX reference mirroring the PyTorch module."""
    if targets.ndim == 2:
        targets = targets[..., None]
    q = jnp.asarray(quantiles, dtype=jnp.float32).reshape(1, 1, -1)
    errors = targets.astype(jnp.float32) - predictions.astype(jnp.float32)
    losses = jnp.where(errors >= 0, q * errors, (1.0 - q) * (-errors))
    return jnp.mean(losses)


if __name__ == "__main__":
    key = jax.random.PRNGKey(0)
    k1, k2, k3, k4, k5, k6 = jax.random.split(key, 6)

    # Test 1: small shapes from the module docstring (Q | 128 -> W=32, one tile).
    B, T, Q = 2, 8, 4
    quantiles = jnp.array([0.1, 0.25, 0.5, 0.9], dtype=jnp.float32)
    predictions = jax.random.normal(k1, (B, T, Q), dtype=jnp.float32)
    targets = jax.random.normal(k2, (B, T), dtype=jnp.float32)
    loss = jax.block_until_ready(quantile_loss(predictions, targets, quantiles))
    expected = quantile_loss_ref(predictions, targets, quantiles)
    assert jnp.allclose(loss, expected, rtol=1e-5, atol=1e-6), (loss, expected)

    # Test 2: Q = 5 (does not divide 128 -> W=128, no Q-padding), ragged tail,
    # multi-tile grid, 2-way partial split with a redundant clamped trailing
    # tile and the in-kernel tail mask.
    B2, T2, Q2 = 4, 700, 5
    quantiles2 = jnp.array([0.05, 0.2, 0.5, 0.8, 0.95], dtype=jnp.float32)
    predictions2 = jax.random.normal(k3, (B2, T2, Q2), dtype=jnp.float32)
    targets2 = jax.random.normal(k4, (B2, T2), dtype=jnp.float32)
    loss2 = jax.block_until_ready(
        quantile_loss(predictions2, targets2, quantiles2,
                      block_rows=8, num_partials=2))
    expected2 = quantile_loss_ref(predictions2, targets2, quantiles2)
    assert jnp.allclose(loss2, expected2, rtol=1e-5, atol=1e-6), (loss2, expected2)

    # Test 3: bf16 predictions, 3-D targets, default (auto) tiling, no tail pad.
    B3, T3, Q3 = 2, 64, 4
    quantiles3 = jnp.array([0.25, 0.5, 0.75, 0.9], dtype=jnp.float32)
    predictions3 = jax.random.normal(
        k5, (B3, T3, Q3), dtype=jnp.float32).astype(jnp.bfloat16)
    targets3 = jax.random.normal(k6, (B3, T3, 1), dtype=jnp.float32)
    loss3 = jax.block_until_ready(quantile_loss(predictions3, targets3, quantiles3))
    expected3 = quantile_loss_ref(predictions3, targets3, quantiles3)
    assert jnp.allclose(loss3, expected3, rtol=1e-4, atol=1e-5), (loss3, expected3)

    print("KERNEL_OK")
</pallas_src>

<mosaic_0001>
module attributes {stable_mosaic.version = 11 : i64} {
  func.func @_quantile_loss_kernel(%arg0: i32, %arg1: i32, %arg2: memref<1x128xf32, #tpu.memory_space<vmem>>, %arg3: memref<32x128xf32, #tpu.memory_space<vmem>>, %arg4: memref<8x128xf32, #tpu.memory_space<vmem>>, %arg5: memref<8x32xf32, #tpu.memory_space<vmem>>, %arg6: memref<1x8x128xf32, #tpu.memory_space<vmem>>, %arg7: memref<8x128xf32, #tpu.memory_space<vmem>>) attributes {dimension_semantics = [#tpu.dimension_semantics<arbitrary>, #tpu.dimension_semantics<arbitrary>], iteration_bounds = array<i64: 1, 1>, scalar_prefetch = 0 : i64, scratch_operands = 1 : i64, tpu.core_type = #tpu.core_type<tc>, window_params = [{pipeline_mode = #tpu.pipeline_mode<synchronous>, transform_indices = @transform_0, window_bounds = array<i64: 1, 128>}, {pipeline_mode = #tpu.pipeline_mode<synchronous>, transform_indices = @transform_1, window_bounds = array<i64: 32, 128>}, {transform_indices = @transform_2, window_bounds = array<i64: 8, 128>}, {transform_indices = @transform_3, window_bounds = array<i64: 8, 32>}, {transform_indices = @transform_4, window_bounds = array<i64: 1, 8, 128>}]} {
    %c0_i32 = arith.constant 0 : i32
    %0 = arith.cmpi eq, %arg1, %c0_i32 : i32
    %1 = arith.extui %0 : i1 to i32
    %c0_i32_0 = arith.constant 0 : i32
    %2 = arith.cmpi ne, %1, %c0_i32_0 : i32
    scf.if %2 {
      %cst = arith.constant 0.000000e+00 : f32
      %12 = vector.broadcast %cst : f32 to vector<8x128xf32>
      %c0 = arith.constant 0 : index
      %c0_5 = arith.constant 0 : index
      %13 = vector.load %arg7[%c0, %c0_5] : memref<8x128xf32, #tpu.memory_space<vmem>>, vector<8x128xf32>
      tpu.vector_store %arg7[%c0, %c0_5], %12 {strides = array<i32>} : memref<8x128xf32, #tpu.memory_space<vmem>>, vector<8x128xf32>,
    } else {
    }
    %c1_i32 = arith.constant 1 : i32
    %3 = arith.muli %arg0, %c1_i32 : i32
    %4 = arith.addi %3, %arg1 : i32
    %c8_i32 = arith.constant 8 : i32
    %5 = arith.muli %4, %c8_i32 : i32
    %c1_i32_1 = arith.constant 1 : i32
    %6 = arith.cmpi slt, %5, %c1_i32_1 : i32
    %7 = arith.extui %6 : i1 to i32
    %c0_i32_2 = arith.constant 0 : i32
    %8 = arith.cmpi ne, %7, %c0_i32_2 : i32
    scf.if %8 {
      %c0 = arith.constant 0 : index
      %c0_5 = arith.constant 0 : index
      %12 = vector.load %arg4[%c0, %c0_5] : memref<8x128xf32, #tpu.memory_space<vmem>>, vector<8x128xf32>
      %c0_6 = arith.constant 0 : index
      %c0_7 = arith.constant 0 : index
      %13 = vector.load %arg5[%c0_6, %c0_7] : memref<8x32xf32, #tpu.memory_space<vmem>>, vector<8x32xf32>
      %c0_8 = arith.constant 0 : index
      %c0_9 = arith.constant 0 : index
      %14 = vector.load %arg3[%c0_8, %c0_9] : memref<32x128xf32, #tpu.memory_space<vmem>>, vector<32x128xf32>
      %cst = arith.constant dense<0.000000e+00> : vector<8x128xf32>
      %15 = tpu.matmul %13, %14, %cst {dimension_numbers = #tpu.dot_dimension_numbers<[1], [0], [0], [1], [0, 0, 1, 1], [], []>} : vector<8x32xf32>, vector<32x128xf32>, vector<8x128xf32> -> vector<8x128xf32>
      %16 = arith.subf %15, %12 : vector<8x128xf32>
      %c0_10 = arith.constant 0 : index
      %c0_11 = arith.constant 0 : index
      %17 = vector.load %arg2[%c0_10, %c0_11] : memref<1x128xf32, #tpu.memory_space<vmem>>, vector<1x128xf32>
      %18 = vector.broadcast %17 : vector<1x128xf32> to vector<8x128xf32>
      %19 = arith.mulf %16, %18 : vector<8x128xf32>
      %cst_12 = arith.constant 0.000000e+00 : f32
      %20 = vector.broadcast %cst_12 : f32 to vector<8x128xf32>
      %21 = arith.minimumf %16, %20 : vector<8x128xf32>
      %22 = arith.subf %19, %21 : vector<8x128xf32>
      %c1_i32_13 = arith.constant 1 : i32
      %23 = arith.subi %c1_i32_13, %5 : i32
      %c8_i32_14 = arith.constant 8 : i32
      %24 = arith.cmpi sge, %23, %c8_i32_14 : i32
      %25 = arith.extui %24 : i1 to i32
      %c0_i32_15 = arith.constant 0 : i32
      %26 = arith.cmpi ne, %25, %c0_i32_15 : i32
      scf.if %26 {
        %c0_18 = arith.constant 0 : index
        %c0_19 = arith.constant 0 : index
        %30 = vector.load %arg7[%c0_18, %c0_19] : memref<8x128xf32, #tpu.memory_space<vmem>>, vector<8x128xf32>
        %31 = vector.shape_cast %22 : vector<8x128xf32> to vector<1x8x128xf32>
        %cst_20 = arith.constant dense<0.000000e+00> : vector<8x128xf32>
        %32 = vector.multi_reduction <add>, %31, %cst_20 [0] : vector<1x8x128xf32> to vector<8x128xf32>
        %33 = arith.addf %30, %32 : vector<8x128xf32>
        %c0_21 = arith.constant 0 : index
        %c0_22 = arith.constant 0 : index
        %34 = vector.load %arg7[%c0_21, %c0_22] : memref<8x128xf32, #tpu.memory_space<vmem>>, vector<8x128xf32>
        tpu.vector_store %arg7[%c0_21, %c0_22], %33 {strides = array<i32>} : memref<8x128xf32, #tpu.memory_space<vmem>>, vector<8x128xf32>,
      } else {
      }
      %c8_i32_16 = arith.constant 8 : i32
      %27 = arith.cmpi slt, %23, %c8_i32_16 : i32
      %28 = arith.extui %27 : i1 to i32
      %c0_i32_17 = arith.constant 0 : i32
      %29 = arith.cmpi ne, %28, %c0_i32_17 : i32
      scf.if %29 {
        %30 = tpu.iota {dimensions = array<i32: 0>} : vector<8x128xi32>
        %31 = vector.broadcast %23 : i32 to vector<8x128xi32>
        %32 = arith.cmpi slt, %30, %31 : vector<8x128xi32>
        %cst_18 = arith.constant 0.000000e+00 : f32
        %33 = vector.broadcast %cst_18 : f32 to vector<8x128xf32>
        %34 = arith.select %32, %22, %33 : vector<8x128xi1>, vector<8x128xf32>
        %c0_19 = arith.constant 0 : index
        %c0_20 = arith.constant 0 : index
        %35 = vector.load %arg7[%c0_19, %c0_20] : memref<8x128xf32, #tpu.memory_space<vmem>>, vector<8x128xf32>
        %36 = vector.shape_cast %34 : vector<8x128xf32> to vector<1x8x128xf32>
        %cst_21 = arith.constant dense<0.000000e+00> : vector<8x128xf32>
        %37 = vector.multi_reduction <add>, %36, %cst_21 [0] : vector<1x8x128xf32> to vector<8x128xf32>
        %38 = arith.addf %35, %37 : vector<8x128xf32>
        %c0_22 = arith.constant 0 : index
        %c0_23 = arith.constant 0 : index
        %39 = vector.load %arg7[%c0_22, %c0_23] : memref<8x128xf32, #tpu.memory_space<vmem>>, vector<8x128xf32>
        tpu.vector_store %arg7[%c0_22, %c0_23], %38 {strides = array<i32>} : memref<8x128xf32, #tpu.memory_space<vmem>>, vector<8x128xf32>,
      } else {
      }
    } else {
    }
    %c0_i32_3 = arith.constant 0 : i32
    %9 = arith.cmpi eq, %arg1, %c0_i32_3 : i32
    %10 = arith.extui %9 : i1 to i32
    %c0_i32_4 = arith.constant 0 : i32
    %11 = arith.cmpi ne, %10, %c0_i32_4 : i32
    scf.if %11 {
      %c0 = arith.constant 0 : index
      %c0_5 = arith.constant 0 : index
      %12 = vector.load %arg7[%c0, %c0_5] : memref<8x128xf32, #tpu.memory_space<vmem>>, vector<8x128xf32>
      %c0_6 = arith.constant 0 : index
      %c0_7 = arith.constant 0 : index
      %c0_8 = arith.constant 0 : index
      %13 = vector.load %arg6[%c0_6, %c0_7, %c0_8] : memref<1x8x128xf32, #tpu.memory_space<vmem>>, vector<1x8x128xf32>
      %14 = vector.shape_cast %13 : vector<1x8x128xf32> to vector<8x128xf32>
      %15 = vector.shape_cast %12 : vector<8x128xf32> to vector<1x8x128xf32>
      tpu.vector_store %arg6[%c0_6, %c0_7, %c0_8], %15 {strides = array<i32>} : memref<1x8x128xf32, #tpu.memory_space<vmem>>, vector<1x8x128xf32>,
    } else {
    }
    return
  }
  func.func @transform_0(%arg0: i32, %arg1: i32) -> (i32, i32) {
    %c0_i32 = arith.constant 0 : i32
    %c0_i32_0 = arith.constant 0 : i32
    %c0_i32_1 = arith.constant 0 : i32
    return %c0_i32, %c0_i32_0 : i32, i32
  }
  func.func @transform_1(%arg0: i32, %arg1: i32) -> (i32, i32) {
    %c0_i32 = arith.constant 0 : i32
    %c0_i32_0 = arith.constant 0 : i32
    %c0_i32_1 = arith.constant 0 : i32
    return %c0_i32, %c0_i32_0 : i32, i32
  }
  func.func @transform_2(%arg0: i32, %arg1: i32) -> (i32, i32) {
    %c1_i32 = arith.constant 1 : i32
    %0 = arith.muli %arg0, %c1_i32 : i32
    %1 = arith.addi %0, %arg1 : i32
    %c0_i32 = arith.constant 0 : i32
    %2 = arith.minsi %1, %c0_i32 : i32
    %c0_i32_0 = arith.constant 0 : i32
    %c0_i32_1 = arith.constant 0 : i32
    return %2, %c0_i32_0 : i32, i32
  }
  func.func @transform_3(%arg0: i32, %arg1: i32) -> (i32, i32) {
    %c1_i32 = arith.constant 1 : i32
    %0 = arith.muli %arg0, %c1_i32 : i32
    %1 = arith.addi %0, %arg1 : i32
    %c0_i32 = arith.constant 0 : i32
    %2 = arith.minsi %1, %c0_i32 : i32
    %c0_i32_0 = arith.constant 0 : i32
    %c0_i32_1 = arith.constant 0 : i32
    return %2, %c0_i32_0 : i32, i32
  }
  func.func @transform_4(%arg0: i32, %arg1: i32) -> (i32, i32, i32) {
    %c0_i32 = arith.constant 0 : i32
    %c0_i32_0 = arith.constant 0 : i32
    %c0_i32_1 = arith.constant 0 : i32
    return %arg0, %c0_i32, %c0_i32_0 : i32, i32, i32
  }
}

</mosaic_0001>

<bundles_post_ra>
// kernel: tpu_custom_call.1
= control target key start
LH: loop header
LB: loop body
LE: loop exit
PB: predicated region body
PF: predicated region fallthrough
CT: control target
= control target key end

     0   :  { %9 = vsyncpa [#allocation4], 0  ;;  %s459_s0 = inlined_call_operand.hbm [shape: f32[1,128], index: 0, kind: input, shape index: {}]   ;;  %s460_s1 = inlined_call_operand.hbm [shape: f32[32,128], index: 1, kind: input, shape index: {}]   ;;  %s461_s2 = inlined_call_operand.vmem [shape: f32[1,128], index: 2, kind: input, shape index: {}]   ;;  %s462_s3 = inlined_call_operand.vmem [shape: f32[1,32], index: 3, kind: input, shape index: {}]   ;;  %s463_s4 = inlined_call_operand.hbm [shape: f32[1,8,128], index: 4, kind: output, shape index: {}]  }
   0x1   :  { %10 = vsyncpa [#allocation7], 0 }
   0x2   :  { %11 = vsyncpa [#allocation5], 0  ;;  %s377_s15 = smov [#allocation3]   ;;  %s378_s17 = smov [#allocation6]  }
   0x3   :  { %s18_s16 = sshll.u32 %s377_s15, 4  ;;  %s27_s18 = sshll.u32 %s378_s17, 4  ;;  %s19_s16 = int_to_ptr.vmem [resolvable:$true] %s18_s16  ;;  %s410_s18 = int_to_ptr.vmem [resolvable:$true] %s27_s18 }
   0x4   :  { %s305_s21 = scalar_lea.hbm %s459_s0, 16 }
   0x5   :  { %p306_p0 = scmp.ne.s32.totalorder %s459_s0, %s305_s21  ;;  %p309_p1 = scmp.lt.u32.totalorder %s305_s21, %s459_s0 }
   0x7   :  { %p311_p2 = pnand %p309_p1, %p306_p0 }
   0x9   :  { %314 = shalt.err (!%p311_p2)
}
   0xa   :  { %s315_s26 = scalar_lea.vmem %s19_s16, 16  ;;  %s319_s27 = scalar_lea.vmem %s19_s16, 32 }
   0xb   :  { %p316_p3 = scmp.ne.s32.totalorder %s19_s16, %s315_s26  ;;  %p320_p4 = scmp.lt.s32.totalorder %s19_s16, %s19_s16 }
   0xc   :  { %p321_p5 = scmp.lt.s32.totalorder %s319_s27, %s315_s26 }
   0xe   :  { %p322_p6 = por %p321_p5, %p320_p4 }
  0x10   :  { %p323_p7 = pnand %p322_p6, %p316_p3 }
  0x12   :  { %326 = shalt.err (!%p323_p7)
}
  0x13   :  { %21 = dma.hbm_to_vmem [thread:$0]  %s459_s0, 16, %s19_s16, [#allocation4]  }
  0x14   :  { %s327_s6 = scalar_lea.hbm %s460_s1, 512 }
  0x15   :  { %p328_p8 = scmp.ne.s32.totalorder %s460_s1, %s327_s6  ;;  %p331_p9 = scmp.lt.u32.totalorder %s327_s6, %s460_s1 }
  0x17   :  { %p333_p10 = pnand %p331_p9, %p328_p8 }
  0x19   :  { %336 = shalt.err (!%p333_p10)
}
  0x1a   :  { %s337_s11 = scalar_lea.vmem %s410_s18, 512  ;;  %p342_p12 = scmp.lt.s32.totalorder %s410_s18, %s410_s18 }
  0x1b   :  { %p338_p11 = scmp.ne.s32.totalorder %s410_s18, %s337_s11  ;;  %p343_p13 = scmp.lt.s32.totalorder %s337_s11, %s337_s11 }
  0x1d   :  { %p344_p0 = por %p343_p13, %p342_p12 }
  0x1f   :  { %p345_p1 = pnand %p344_p0, %p338_p11 }
  0x21   :  { %348 = shalt.err (!%p345_p1)
}
  0x22   :  { %s379_s0 = smov 128   ;;  %s380_s12 = smov 8  }
  0x23   :  { %33 = dma.hbm_to_vmem [thread:$0]  %s460_s1, 512, %s410_s18, [#allocation7], %s379_s0, %s379_s0, %s380_s12  }
  0x24   :  { %371 = dma.done.wait [#allocation4], 16  }
  0x25   :  { %372 = vsyncadd [#allocation4], 4294967280 }
  0x26   :  { %373 = dma.done.wait [#allocation7], 512  }
  0x27   :  { %374 = vsyncadd [#allocation7], 4294966784  ;;  %v381_v0 = vmov 0.0|0.0   ;;  %vm382_vm0 = vmmov 0   ;;  %v383_v1 = vmov 0.0   ;;  %v135_v2 = vld [vmem:[#allocation6] sm:$0xff]  ;;  %v237_v9 = vlaneseq }
  0x28   :  { %291 = vmatprep.subr.bf16.mxu0 %v381_v0  ;;  %288 = vmatprep.mubr.msk.f32.mxu0 %vm382_vm0, %v383_v1  ;;  %v136_v3 = vld [vmem:[#allocation6 + $0x8] sm:$0xff]  ;;  %v137_v4 = vld [vmem:[#allocation6 + $0x10] sm:$0xff]  ;;  %v138_v6 = vld [vmem:[#allocation6 + $0x18] sm:$0xff]  ;;  %vm139_vm1 = vcmask 261120   ;;  %s384_s18 = smov [#allocation8]  }
  0x29   :  { %v292_v5 = vpack.c.bf16 %v136_v3, %v135_v2  ;;  %v295_v7 = vpack.c.bf16 %v138_v6, %v137_v4  ;;  %v134_v8 = vld [vmem:[%s462_s3] sm:$0xff]  ;;  %v238_v13 = vshrl.u32 %v237_v9, 7  ;;  %s257_s19 = sshll.u32 %s384_s18, 4  ;;  %s258_s19 = int_to_ptr.vmem [resolvable:$true] %s257_s19 }
  0x2a   :  { %v133_v10 = vld [vmem:[%s461_s2] sm:$0xff]  ;;  %s349_s3 = scalar_lea.vmem %s258_s19, 128  ;;  %p354_p3 = scmp.lt.s32.totalorder %s258_s19, %s258_s19 }
  0x2b   :  { %293 = vmatpush3.bf16.msra.mxu0 %v292_v5  ;;  %v274_v12 = vld [vmem:[#allocation3] ss:$0 sm:$0xff]  ;;  %vm240_vm2 = vcmp.lt.s32.totalorder %v238_v13, 1  ;;  %p350_p2 = scmp.ne.s32.totalorder %s258_s19, %s349_s3  ;;  %p355_p4 = scmp.lt.s32.totalorder %s349_s3, %s349_s3 }
  0x2c   :  { %294 = vmatprep.subr.bf16.mxu0 %v381_v0 }
  0x2d   :  { %p356_p5 = por %p355_p4, %p354_p3 }
  0x2f   :  { %296 = vmatpush3.bf16.msra.mxu0 %v295_v7  ;;  %p357_p6 = pnand %p356_p5, %p350_p2 }
  0x32   :  { %289 = vmatmul.mubr.msk.f32.vlgmr.msra.gmra.mrb[0].mxu0 %vm139_vm1, %v134_v8 }
 0x105   :  { %v209_v11 = vpop.f32.mrb[0].mxu0 }
 0x106   :  { %v213_v14 = vsub.f32 %v209_v11, %v133_v10  ;;  %v290_v15 = vpop.f32.mrb[1].mxu0 }
 0x108   :  { %v221_v16 = vmul.f32 %v274_v12, %v213_v14  ;;  %v222_v17 = vmin.f32 %v213_v14, 0.0 }
 0x10a   :  { %v223_v18 = vsub.f32 %v221_v16, %v222_v17 }
 0x10c   :  { %v241_v19 = vsel %vm240_vm2, %v223_v18, 0.0 }
 0x10d   :  { %250 = vst [vmem:[#allocation8] sm:$0xff] %v241_v19 }
 0x10e   :  { %360 = shalt.err (!%p357_p6)
}
 0x10f   :  { %s361_s21 = scalar_lea.hbm %s463_s4, 128 }
 0x110   :  { %p362_p7 = scmp.ne.s32.totalorder %s463_s4, %s361_s21  ;;  %p365_p8 = scmp.lt.u32.totalorder %s361_s21, %s463_s4 }
 0x112   :  { %p367_p9 = pnand %p365_p8, %p362_p7 }
 0x114   :  { %370 = shalt.err (!%p367_p9)
}
 0x115   :  { %260 = dma.vmem_to_hbm [thread:$0]  %s258_s19, 128, %s463_s4, [#allocation5]  }
 0x116   :  { %375 = dma.done.wait [#allocation5], 128  }
 0x117   :  { %376 = vsyncadd [#allocation5], 4294967168 }
 0x118   :  { %264 = vsyncpa [#allocation4], 1 }
 0x119   :  { %265 = vsyncpa [#allocation7], 1 }
 0x11a   :  { %266 = vsyncpa [#allocation5], 1 }

</bundles_post_ra>
